<compile_context>
chip_gen: v6e
topology: v6e:2x2x1
jax: 0.10.0
libtpu: 0.0.40
codegen_flags: <defaults>
</compile_context>

<pallas_src>
import functools

import numpy as np
import jax
import jax.numpy as jnp
from jax import lax
from jax.experimental import pallas as pl
from jax.experimental.pallas import tpu as pltpu


# ---------------------------------------------------------------------------
# One-time probe: pin down pltpu.roll's shift convention (and availability).
# Returns ("roll", sign) where the shift realizing  s[c] = x[c + delta]  is
# (sign * delta) mod axis_len, or ("concat", 0) as a safe fallback.
# ---------------------------------------------------------------------------
@functools.lru_cache(maxsize=None)
def _roll_mode():
    try:
        def probe(x_ref, o_ref):
            o_ref[...] = pltpu.roll(x_ref[...], 1, axis=1)

        x = jnp.broadcast_to(lax.iota(jnp.float32, 128)[None, :], (8, 128))
        out = pl.pallas_call(
            probe, out_shape=jax.ShapeDtypeStruct((8, 128), jnp.float32))(x)
        first = float(jax.block_until_ready(out)[0, 0])
        if first == 127.0:      # numpy convention: roll(x, +1)[0] == x[-1]
            return ("roll", -1)
        if first == 1.0:        # inverted convention
            return ("roll", 1)
        return ("concat", 0)
    except Exception:
        # TODO(synk): silent perf-path fallback; worth logging when hit in production.
        return ("concat", 0)


# ---------------------------------------------------------------------------
# Per-generation tuning: (target bytes per input block, min grid steps, VMEM cap).
# ---------------------------------------------------------------------------
@functools.lru_cache(maxsize=None)
def _chip_tuning():
    kind = ""
    try:
        kind = jax.devices()[0].device_kind.lower()
    except Exception:
        pass
    try:
        vmem_cap = int(pltpu.get_tpu_info().vmem_capacity_bytes)
    except Exception:
        vmem_cap = 64 << 20                      # conservative (v7x per-TC size)

    flat = kind.replace(" ", "")
    if ("v7" in flat) or ("7x" in flat) or ("tpu7" in flat):
        # v7x: 64 MiB VMEM/TC, 2 TCs -> small blocks, guarantee >=4 parallel steps.
        return (2 << 20, 4, vmem_cap)
    if "v6" in flat:
        # v6e: ~1.4 TB/s, 128 MiB VMEM -> bigger blocks amortize per-step overhead.
        return (4 << 20, 2, vmem_cap)
    # v5e / default: 1-2 MiB blocks already put per-step overhead under ~5%.
    return (2 << 20, 2, vmem_cap)


def _sublane_multiple(dtype):
    # 8 rows for 32-bit, 16 for 16-bit, 32 for 8-bit packed layouts.
    return 8 * max(1, 4 // jnp.dtype(dtype).itemsize)


def _residue_kernel(W, HW, B, bt, ragged, mode, shift_x, shift_y,
                    warx_ref, wary_ref, un_ref, out_ref):
    # Blocks are (bt, H*W) in each input's NATIVE dtype; upcast in-kernel (VPU,
    # hidden under the HBM stream).
    u = un_ref[...].astype(jnp.float32)
    wx = warx_ref[...].astype(jnp.float32)
    wy = wary_ref[...].astype(jnp.float32)

    def fetch_fwd(delta, shift):
        # v[:, c] = u[:, c + delta]; wrapped positions are masked to zero below,
        # matching the ZeroPad2d of the torch module.
        if mode == "roll":
            return pltpu.roll(u, shift, axis=1)          # XLU slot, off the VPU
        return jnp.concatenate([u[:, delta:], u[:, :delta]], axis=1)

    col = lax.broadcasted_iota(jnp.int32, (bt, HW), 1)

    # Forward difference along the image W axis (lane position within each row of
    # width W); the last column of every image row is zero-padded.
    # The bitmask assumes power-of-two W (true for the module's 32/256).
    gx = jnp.where(jnp.bitwise_and(col, W - 1) == W - 1,
                   jnp.float32(0.0), fetch_fwd(1, shift_x) - u)
    # Forward difference along the image H axis (stride W in the flattened layout);
    # the last image row is zero-padded.
    gy = jnp.where(col >= HW - W,
                   jnp.float32(0.0), fetch_fwd(W, shift_y) - u)

    term = jnp.abs(wx - gx) + jnp.abs(wy - gy)

    if ragged:
        # The last grid step's block hangs past row B: those rows hold unspecified
        # data (possibly NaN/inf), so SELECT them away (never multiply by 0).
        row = pl.program_id(0) * bt + lax.broadcasted_iota(jnp.int32, (bt, HW), 0)
        term = jnp.where(row < B, term, jnp.float32(0.0))

    # One scalar partial sum per grid step, broadcast into this step's own
    # (1, 8, 128)-aligned output block -> grid axis stays fully parallel.
    out_ref[...] = jnp.broadcast_to(jnp.sum(term), out_ref.shape)


def residue(warx, wary, unwarpped, enc=True):
    """JAX/Pallas equivalent of residue.forward(warx, wary, unwarpped, enc)."""
    N, C, H, W = unwarpped.shape
    expected = 32 if enc else 256
    assert H == expected and W == expected, (H, W, expected)
    assert warx.shape == unwarpped.shape and wary.shape == unwarpped.shape
    assert (W & (W - 1)) == 0, "W must be a power of two (32 or 256 in the module)"

    B = N * C
    HW = H * W
    assert HW % 128 == 0

    # Stream each input in its NATIVE dtype (no wrapper astype / no extra HBM pass);
    # the kernel upcasts to f32.
    wx = warx.reshape(B, HW)
    wy = wary.reshape(B, HW)
    un = unwarpped.reshape(B, HW)
    dtypes = (wx.dtype, wy.dtype, un.dtype)
    itemsizes = [jnp.dtype(d).itemsize for d in dtypes]
    max_itemsize = max(itemsizes)
    sub = max(_sublane_multiple(d) for d in dtypes)

    target_block_bytes, min_steps, vmem_cap = _chip_tuning()

    # ---- block sizing --------------------------------------------------------
    b_ceil = -(-B // sub) * sub
    bt = max(sub, (target_block_bytes // (HW * max_itemsize)) // sub * sub)
    # Keep >= min_steps grid steps when B allows (v7x: shard across both TCs and
    # keep each core's double-buffer pipeline busy).
    cap = max(sub, (b_ceil // min_steps) // sub * sub)
    bt = min(bt, cap, b_ceil)
    if bt >= B:
        bt = B                      # block == full dim: always legal, no tail mask
    n_steps = -(-B // bt)
    ragged = (B % bt) != 0          # last block reads past B -> mask in-kernel

    mode, sign = _roll_mode()
    shift_x = (sign * 1) % HW
    shift_y = (sign * W) % HW
    kernel = functools.partial(_residue_kernel, W, HW, B, bt, ragged,
                               mode, shift_x, shift_y)

    in_spec = pl.BlockSpec((bt, HW), lambda s: (s, 0))
    # TODO(synk): on v7x, if an xprof trace still shows exposed DMA at step
    # boundaries, try pipeline_mode=pl.Buffered(3) on the input specs (+50% input VMEM).

    # VMEM budget from actual usage: 3 double-buffered input blocks + ~8 block-sized
    # f32 temporaries (upcasts, two rolls, iota, gx/gy/term) + slack, clamped to 75%
    # of this chip's physical VMEM.
    block_in_bytes = sum(bt * HW * isz for isz in itemsizes)
    est = 2 * block_in_bytes + 8 * bt * HW * 4 + (4 << 20)
    vmem_limit = int(max(min(est, int(0.75 * vmem_cap)), 32 << 20))

    bytes_in = sum(B * HW * isz for isz in itemsizes)
    cost = pl.CostEstimate(flops=10 * B * HW, transcendentals=0,
                           bytes_accessed=bytes_in + n_steps * 8 * 128 * 4)

    partials = pl.pallas_call(
        kernel,
        out_shape=jax.ShapeDtypeStruct((n_steps, 8, 128), jnp.float32),
        grid_spec=pltpu.PrefetchScalarGridSpec(
            num_scalar_prefetch=0,
            grid=(n_steps,),
            in_specs=[in_spec, in_spec, in_spec],
            out_specs=pl.BlockSpec((1, 8, 128), lambda s: (s, 0, 0)),
        ),
        compiler_params=pltpu.CompilerParams(
            dimension_semantics=("parallel",),      # v7x: shard steps over both TCs
            vmem_limit_bytes=vmem_limit,
        ),
        cost_estimate=cost,
    )(wx, wy, un)

    # Tiny epilogue: one partial sum per grid step -> mean over true element count.
    total = jnp.sum(partials[:, 0, 0])
    return (total / jnp.float32(B * H * W)).astype(jnp.float32)


def _residue_ref(warx, wary, unwarpped):
    """Pure-jnp reference mirroring the PyTorch forward."""
    gx = unwarpped[:, :, :, 1:] - unwarpped[:, :, :, :-1]
    gx = jnp.pad(gx, ((0, 0), (0, 0), (0, 0), (0, 1)))
    gy = unwarpped[:, :, 1:, :] - unwarpped[:, :, :-1, :]
    gy = jnp.pad(gy, ((0, 0), (0, 0), (0, 1), (0, 0)))
    return jnp.mean(jnp.abs(warx - gx) + jnp.abs(wary - gy))


if __name__ == "__main__":
    base = jax.random.PRNGKey(0)

    cases = [
        (0, 2, 4, 32, 32, True),      # basic enc=True, single full block (bt == B)
        (1, 3, 5, 32, 32, True),      # B=15 -> ragged last block, in-kernel row mask
        (2, 8, 64, 32, 32, True),     # B=512 -> multi-step parallel grid of partials
        (3, 1, 2, 256, 256, False),   # enc=False (256x256), bt == B < sublane multiple
    ]
    for seed, N, C, H, W, enc in cases:
        k1, k2, k3 = jax.random.split(jax.random.fold_in(base, seed), 3)
        warx = jax.random.normal(k1, (N, C, H, W), dtype=jnp.float32)
        wary = jax.random.normal(k2, (N, C, H, W), dtype=jnp.float32)
        unwarpped = jax.random.normal(k3, (N, C, H, W), dtype=jnp.float32)

        out = jax.block_until_ready(residue(warx, wary, unwarpped, enc=enc))
        ref = jax.block_until_ready(_residue_ref(warx, wary, unwarpped))
        np.testing.assert_allclose(np.asarray(out), np.asarray(ref),
                                   rtol=1e-5, atol=1e-5)

    print("KERNEL_OK")
</pallas_src>

<mosaic_0001>
module attributes {stable_mosaic.version = 11 : i64} {
  func.func @probe(%arg0: memref<8x128xf32, #tpu.memory_space<vmem>>, %arg1: memref<8x128xf32, #tpu.memory_space<vmem>>) attributes {dimension_semantics = [], scalar_prefetch = 0 : i64, scratch_operands = 0 : i64, tpu.core_type = #tpu.core_type<tc>} {
    %c0 = arith.constant 0 : index
    %c0_0 = arith.constant 0 : index
    %0 = vector.load %arg0[%c0, %c0_0] : memref<8x128xf32, #tpu.memory_space<vmem>>, vector<8x128xf32>
    %c1_i32 = arith.constant 1 : i32
    %1 = tpu.dynamic_rotate %0 by %c1_i32 dim 1 : vector<8x128xf32>, i32 -> vector<8x128xf32>
    %c0_1 = arith.constant 0 : index
    %c0_2 = arith.constant 0 : index
    %2 = vector.load %arg1[%c0_1, %c0_2] : memref<8x128xf32, #tpu.memory_space<vmem>>, vector<8x128xf32>
    tpu.vector_store %arg1[%c0_1, %c0_2], %1 {strides = array<i32>} : memref<8x128xf32, #tpu.memory_space<vmem>>, vector<8x128xf32>,
    return
  }
}

module attributes {stable_mosaic.version = 11 : i64} {
  func.func @_residue_kernel(%arg0: i32, %arg1: memref<8x1024xf32, #tpu.memory_space<vmem>>, %arg2: memref<8x1024xf32, #tpu.memory_space<vmem>>, %arg3: memref<8x1024xf32, #tpu.memory_space<vmem>>, %arg4: memref<1x8x128xf32, #tpu.memory_space<vmem>>) attributes {dimension_semantics = [#tpu.dimension_semantics<parallel>], iteration_bounds = array<i64: 1>, scalar_prefetch = 0 : i64, scratch_operands = 0 : i64, tpu.core_type = #tpu.core_type<tc>, window_params = [{transform_indices = @transform_0, window_bounds = array<i64: 8, 1024>}, {transform_indices = @transform_1, window_bounds = array<i64: 8, 1024>}, {transform_indices = @transform_2, window_bounds = array<i64: 8, 1024>}, {transform_indices = @transform_3, window_bounds = array<i64: 1, 8, 128>}]} {
    %c0 = arith.constant 0 : index
    %c0_0 = arith.constant 0 : index
    %0 = vector.load %arg3[%c0, %c0_0] : memref<8x1024xf32, #tpu.memory_space<vmem>>, vector<8x1024xf32>
    %c0_1 = arith.constant 0 : index
    %c0_2 = arith.constant 0 : index
    %1 = vector.load %arg1[%c0_1, %c0_2] : memref<8x1024xf32, #tpu.memory_space<vmem>>, vector<8x1024xf32>
    %c0_3 = arith.constant 0 : index
    %c0_4 = arith.constant 0 : index
    %2 = vector.load %arg2[%c0_3, %c0_4] : memref<8x1024xf32, #tpu.memory_space<vmem>>, vector<8x1024xf32>
    %3 = tpu.iota {dimensions = array<i32: 1>} : vector<8x1024xi32>
    %c31_i32 = arith.constant 31 : i32
    %4 = vector.broadcast %c31_i32 : i32 to vector<8x1024xi32>
    %5 = arith.andi %3, %4 : vector<8x1024xi32>
    %c31_i32_5 = arith.constant 31 : i32
    %6 = vector.broadcast %c31_i32_5 : i32 to vector<8x1024xi32>
    %7 = arith.cmpi eq, %5, %6 : vector<8x1024xi32>
    %8 = vector.extract_strided_slice %0 {offsets = [0, 1], sizes = [8, 1023], strides = [1, 1]} : vector<8x1024xf32> to vector<8x1023xf32>
    %9 = vector.extract_strided_slice %0 {offsets = [0, 0], sizes = [8, 1], strides = [1, 1]} : vector<8x1024xf32> to vector<8x1xf32>
    %10 = tpu.concatenate %8, %9 in 1 : vector<8x1023xf32>, vector<8x1xf32> -> vector<8x1024xf32>
    %11 = arith.subf %10, %0 : vector<8x1024xf32>
    %cst = arith.constant 0.000000e+00 : f32
    %12 = vector.broadcast %cst : f32 to vector<8x1024xf32>
    %13 = arith.select %7, %12, %11 : vector<8x1024xi1>, vector<8x1024xf32>
    %c992_i32 = arith.constant 992 : i32
    %14 = vector.broadcast %c992_i32 : i32 to vector<8x1024xi32>
    %15 = arith.cmpi sge, %3, %14 : vector<8x1024xi32>
    %16 = vector.extract_strided_slice %0 {offsets = [0, 32], sizes = [8, 992], strides = [1, 1]} : vector<8x1024xf32> to vector<8x992xf32>
    %17 = vector.extract_strided_slice %0 {offsets = [0, 0], sizes = [8, 32], strides = [1, 1]} : vector<8x1024xf32> to vector<8x32xf32>
    %18 = tpu.concatenate %16, %17 in 1 : vector<8x992xf32>, vector<8x32xf32> -> vector<8x1024xf32>
    %19 = arith.subf %18, %0 : vector<8x1024xf32>
    %cst_6 = arith.constant 0.000000e+00 : f32
    %20 = vector.broadcast %cst_6 : f32 to vector<8x1024xf32>
    %21 = arith.select %15, %20, %19 : vector<8x1024xi1>, vector<8x1024xf32>
    %22 = arith.subf %1, %13 : vector<8x1024xf32>
    %23 = math.absf %22 : vector<8x1024xf32>
    %24 = arith.subf %2, %21 : vector<8x1024xf32>
    %25 = math.absf %24 : vector<8x1024xf32>
    %26 = arith.addf %23, %25 : vector<8x1024xf32>
    %27 = vector.shape_cast %26 : vector<8x1024xf32> to vector<1x8x1024xf32>
    %cst_7 = arith.constant dense<0.000000e+00> : vector<1xf32>
    %28 = vector.multi_reduction <add>, %27, %cst_7 [1, 2] : vector<1x8x1024xf32> to vector<1xf32>
    %29 = vector.shape_cast %28 : vector<1xf32> to vector<1x1x1xf32>
    %30 = vector.extract %29[0, 0, 0] : f32 from vector<1x1x1xf32>
    %31 = vector.broadcast %30 : f32 to vector<1x8x128xf32>
    %c0_8 = arith.constant 0 : index
    %c0_9 = arith.constant 0 : index
    %c0_10 = arith.constant 0 : index
    %32 = vector.load %arg4[%c0_8, %c0_9, %c0_10] : memref<1x8x128xf32, #tpu.memory_space<vmem>>, vector<1x8x128xf32>
    tpu.vector_store %arg4[%c0_8, %c0_9, %c0_10], %31 {strides = array<i32>} : memref<1x8x128xf32, #tpu.memory_space<vmem>>, vector<1x8x128xf32>,
    return
  }
  func.func @transform_0(%arg0: i32) -> (i32, i32) {
    %c0_i32 = arith.constant 0 : i32
    %c0_i32_0 = arith.constant 0 : i32
    return %arg0, %c0_i32 : i32, i32
  }
  func.func @transform_1(%arg0: i32) -> (i32, i32) {
    %c0_i32 = arith.constant 0 : i32
    %c0_i32_0 = arith.constant 0 : i32
    return %arg0, %c0_i32 : i32, i32
  }
  func.func @transform_2(%arg0: i32) -> (i32, i32) {
    %c0_i32 = arith.constant 0 : i32
    %c0_i32_0 = arith.constant 0 : i32
    return %arg0, %c0_i32 : i32, i32
  }
  func.func @transform_3(%arg0: i32) -> (i32, i32, i32) {
    %c0_i32 = arith.constant 0 : i32
    %c0_i32_0 = arith.constant 0 : i32
    %c0_i32_1 = arith.constant 0 : i32
    return %arg0, %c0_i32, %c0_i32_0 : i32, i32, i32
  }
}

</mosaic_0001>

<bundles_post_ra>
// kernel: tpu_custom_call.1
= control target key start
LH: loop header
LB: loop body
LE: loop exit
PB: predicated region body
PF: predicated region fallthrough
CT: control target
= control target key end

     0   :  { %6 = vsyncpa [#allocation3], 0  ;;  %s106_s0 = inlined_call_operand.hbm [shape: f32[8,128], index: 0, kind: input, shape index: {}]   ;;  %s107_s1 = inlined_call_operand.hbm [shape: f32[8,128], index: 1, kind: output, shape index: {}]  }
   0x1   :  { %7 = vsyncpa [#allocation4], 0  ;;  %s87_s6 = smov [#allocation2]  }
   0x2   :  { %s14_s7 = sshll.u32 %s87_s6, 4  ;;  %s15_s7 = int_to_ptr.vmem [resolvable:$true] %s14_s7 }
   0x3   :  { %s51_s8 = scalar_lea.vmem %s15_s7, 128  ;;  %p56_p1 = scmp.lt.s32.totalorder %s15_s7, %s15_s7 }
   0x4   :  { %p52_p0 = scmp.ne.s32.totalorder %s15_s7, %s51_s8  ;;  %p57_p2 = scmp.lt.s32.totalorder %s51_s8, %s51_s8 }
   0x6   :  { %p58_p3 = por %p57_p2, %p56_p1 }
   0x8   :  { %p59_p4 = pnand %p58_p3, %p52_p0 }
   0xa   :  { %62 = shalt.err (!%p59_p4)
}
   0xb   :  { %17 = dma.hbm_to_vmem [thread:$0]  %s106_s0, 128, %s15_s7, [#allocation3]  }
   0xc   :  { %83 = dma.done.wait [#allocation3], 128  }
   0xd   :  { %84 = vsyncadd [#allocation3], 4294967168  ;;  %v21_v0 = vld [vmem:[#allocation2] sm:$0xff]  ;;  %s88_s11 = smov 1   ;;  %s89_s12 = smov [#allocation5]  }
   0xe   :  { %22 = vrot.lane.b32.xlu0 %v21_v0, %s88_s11  ;;  %s31_s13 = sshll.u32 %s89_s12, 4  ;;  %s32_s13 = int_to_ptr.vmem [resolvable:$true] %s31_s13 }
   0xf   :  { %s63_s14 = scalar_lea.vmem %s32_s13, 128  ;;  %p68_p6 = scmp.lt.s32.totalorder %s32_s13, %s32_s13 }
  0x10   :  { %p64_p5 = scmp.ne.s32.totalorder %s32_s13, %s63_s14  ;;  %p69_p7 = scmp.lt.s32.totalorder %s63_s14, %s63_s14 }
  0x12   :  { %p70_p8 = por %p69_p7, %p68_p6 }
  0x14   :  { %p71_p9 = pnand %p70_p8, %p64_p5 }
  0x80   :  { %v23_v1 = vpop.permute.xlu0 %22 }
  0x81   :  { %24 = vst [vmem:[#allocation5] sm:$0xff] %v23_v1 }
  0x82   :  { %74 = shalt.err (!%p71_p9)
}
  0x83   :  { %34 = dma.vmem_to_hbm [thread:$0]  %s32_s13, 128, %s107_s1, [#allocation4]  }
  0x84   :  { %85 = dma.done.wait [#allocation4], 128  }
  0x85   :  { %86 = vsyncadd [#allocation4], 4294967168 }
  0x86   :  { %38 = vsyncpa [#allocation3], 1 }
  0x87   :  { %39 = vsyncpa [#allocation4], 1 }

// kernel: tpu_custom_call.1
= control target key start
LH: loop header
LB: loop body
LE: loop exit
PB: predicated region body
PF: predicated region fallthrough
CT: control target
= control target key end

     0   :  { %8 = vsyncpa [#allocation3], 0  ;;  %s535_s0 = inlined_call_operand.hbm [shape: f32[8,1024], index: 0, kind: input, shape index: {}]   ;;  %s536_s1 = inlined_call_operand.hbm [shape: f32[8,1024], index: 1, kind: input, shape index: {}]   ;;  %s537_s2 = inlined_call_operand.hbm [shape: f32[8,1024], index: 2, kind: input, shape index: {}]   ;;  %s538_s3 = inlined_call_operand.hbm [shape: f32[1,8,128], index: 3, kind: output, shape index: {}]  }
   0x1   :  { %9 = vsyncpa [#allocation6], 0 }
   0x2   :  { %10 = vsyncpa [#allocation4], 0  ;;  %s383_s12 = smov [#allocation5]   ;;  %s384_s14 = smov [#allocation2]  }
   0x3   :  { %s27_s13 = sshll.u32 %s383_s12, 4  ;;  %s17_s15 = sshll.u32 %s384_s14, 4  ;;  %s28_s13 = int_to_ptr.vmem [resolvable:$true] %s27_s13  ;;  %s18_s15 = int_to_ptr.vmem [resolvable:$true] %s17_s15 }
   0x4   :  { %s305_s16 = scalar_lea.vmem %s28_s13, 1024  ;;  %p310_p1 = scmp.lt.s32.totalorder %s28_s13, %s28_s13 }
   0x5   :  { %p306_p0 = scmp.ne.s32.totalorder %s28_s13, %s305_s16  ;;  %p311_p2 = scmp.lt.s32.totalorder %s305_s16, %s305_s16 }
   0x7   :  { %p312_p3 = por %p311_p2, %p310_p1 }
   0x9   :  { %p313_p4 = pnand %p312_p3, %p306_p0 }
   0xb   :  { %316 = shalt.err (!%p313_p4)
}
   0xc   :  { %30 = dma.hbm_to_vmem [thread:$0]  %s536_s1, 1024, %s28_s13, [#allocation6]  }
   0xd   :  { %s325_s19 = scalar_lea.vmem %s18_s15, 1024  ;;  %p330_p6 = scmp.lt.s32.totalorder %s18_s15, %s18_s15 }
   0xe   :  { %p326_p5 = scmp.ne.s32.totalorder %s18_s15, %s325_s19  ;;  %p331_p7 = scmp.lt.s32.totalorder %s325_s19, %s325_s19 }
  0x10   :  { %p332_p8 = por %p331_p7, %p330_p6 }
  0x12   :  { %p333_p9 = pnand %p332_p8, %p326_p5 }
  0x14   :  { %336 = shalt.err (!%p333_p9)
}
  0x15   :  { %20 = dma.hbm_to_vmem [thread:$0]  %s535_s0, 1024, %s18_s15, [#allocation3]  }
  0x16   :  { %s385_s22 = smov [#allocation7]  }
  0x17   :  { %s37_s23 = sshll.u32 %s385_s22, 4  ;;  %s38_s23 = int_to_ptr.vmem [resolvable:$true] %s37_s23 }
  0x18   :  { %s345_s24 = scalar_lea.vmem %s38_s23, 1024  ;;  %p350_p11 = scmp.lt.s32.totalorder %s38_s23, %s38_s23 }
  0x19   :  { %p346_p10 = scmp.ne.s32.totalorder %s38_s23, %s345_s24  ;;  %p351_p12 = scmp.lt.s32.totalorder %s345_s24, %s345_s24 }
  0x1b   :  { %p352_p13 = por %p351_p12, %p350_p11 }
  0x1d   :  { %p353_p0 = pnand %p352_p13, %p346_p10 }
  0x1f   :  { %356 = shalt.err (!%p353_p0)
}
  0x20   :  { %40 = dma.hbm_to_vmem [thread:$0]  %s537_s2, 1024, %s38_s23, [#allocation6]  }
  0x21   :  { %377 = dma.done.wait [#allocation3], 1024  }
  0x22   :  { %378 = vsyncadd [#allocation3], 4294966272 }
  0x23   :  { %379 = dma.done.wait [#allocation6], 2048  }
  0x24   :  { %380 = vsyncadd [#allocation6], 4294965248  ;;  %v418_v0 = vld [vmem:[#allocation7 + $0x10] sm:$0xff]  ;;  %v420_v1 = vld [vmem:[#allocation7] sm:$0xff]  ;;  %s386_s0 = smov 127   ;;  %s387_s26 = smov 96   ;;  %v74_v8 = vlaneseq }
  0x25   :  { %111 = vrot.lane.b32.xlu1 %v418_v0, %s386_s0  ;;  %107 = vrot.lane.b32.xlu0 %v420_v1, %s386_s0  ;;  %v424_v2 = vld [vmem:[#allocation7 + $0x8] sm:$0xff]  ;;  %v430_v3 = vld [vmem:[#allocation7 + $0x18] sm:$0xff]  ;;  %v434_v4 = vld [vmem:[#allocation7 + $0x20] sm:$0xff]  ;;  %vm123_vm0 = vcmask 1039360   ;;  %vm181_vm1 = vcmask 785408   ;;  %s388_s2 = smov [#allocation8]  }
  0x26   :  { %v438_v5 = vld [vmem:[#allocation7 + $0x28] sm:$0xff]  ;;  %v442_v6 = vld [vmem:[#allocation7 + $0x30] sm:$0xff]  ;;  %v446_v7 = vld [vmem:[#allocation7 + $0x38] sm:$0xff]  ;;  %v75_v9 = vand.u32 127, %v74_v8  ;;  %s279_s27 = sshll.u32 %s388_s2, 4  ;;  %s280_s27 = int_to_ptr.vmem [resolvable:$true] %s279_s27 }
  0x27   :  { %v66_v31 = vld [vmem:[#allocation5] sm:$0xff]  ;;  %v67_v32 = vld [vmem:[#allocation5 + $0x8] sm:$0xff]  ;;  %v68_v49 = vld [vmem:[#allocation5 + $0x10] sm:$0xff]  ;;  %s357_s29 = scalar_lea.vmem %s280_s27, 128  ;;  %p362_p2 = scmp.lt.s32.totalorder %s280_s27, %s280_s27 }
  0x28   :  { %v76_v12 = vadd.s32 128, %v75_v9  ;;  %v77_v15 = vadd.s32 256, %v75_v9  ;;  %v83_v16 = vand.u32 31, %v75_v9  ;;  %v78_v23 = vadd.s32 384, %v75_v9  ;;  %v58_v37 = vld [vmem:[#allocation2] sm:$0xff]  ;;  %v59_v42 = vld [vmem:[#allocation2 + $0x8] sm:$0xff]  ;;  %p358_p1 = scmp.ne.s32.totalorder %s280_s27, %s357_s29  ;;  %p363_p3 = scmp.lt.s32.totalorder %s357_s29, %s357_s29 }
  0x29   :  { %165 = vrot.lane.b32.xlu1 %v420_v1, %s387_s26  ;;  %109 = vrot.lane.b32.xlu0 %v424_v2, %s386_s0  ;;  %v79_v27 = vadd.s32 512, %v75_v9  ;;  %v60_v50 = vld [vmem:[#allocation2 + $0x10] sm:$0xff]  ;;  %v80_v55 = vadd.s32 640, %v75_v9  ;;  %v69_v57 = vld [vmem:[#allocation5 + $0x18] sm:$0xff] }
  0x2a   :  { %v84_v18 = vand.u32 31, %v76_v12  ;;  %v85_v22 = vand.u32 31, %v77_v15  ;;  %vm91_vm2 = vcmp.eq.s32.totalorder %v83_v16, 31  ;;  %v86_v36 = vand.u32 31, %v78_v23  ;;  %v61_v62 = vld [vmem:[#allocation2 + $0x18] sm:$0xff]  ;;  %p364_p4 = por %p363_p3, %p362_p2 }
  0x2b   :  { %v87_v41 = vand.u32 31, %v79_v27  ;;  %v73_v60 = vld [vmem:[#allocation5 + $0x38] sm:$0xff] }
  0x2c   :  { %vm92_vm3 = vcmp.eq.s32.totalorder %v84_v18, 31  ;;  %vm464_vm4 = vcmp.eq.s32.totalorder %v85_v22, 31  ;;  %vm474_vm5 = vcmp.eq.s32.totalorder %v86_v36, 31  ;;  %v70_v22 = vld [vmem:[#allocation5 + $0x20] sm:$0xff]  ;;  %p365_p5 = pnand %p364_p4, %p358_p1 }
  0x2d   :  { %169 = vrot.lane.b32.xlu1 %v418_v0, %s387_s26  ;;  %167 = vrot.lane.b32.xlu0 %v424_v2, %s387_s26  ;;  %vm480_vm6 = vcmp.eq.s32.totalorder %v87_v41, 31 }
  0x31   :  { %171 = vrot.lane.b32.xlu1 %v430_v3, %s387_s26  ;;  %113 = vrot.lane.b32.xlu0 %v430_v3, %s386_s0 }
  0x35   :  { %173 = vrot.lane.b32.xlu1 %v434_v4, %s387_s26  ;;  %115 = vrot.lane.b32.xlu0 %v434_v4, %s386_s0 }
  0x39   :  { %175 = vrot.lane.b32.xlu1 %v438_v5, %s387_s26  ;;  %117 = vrot.lane.b32.xlu0 %v438_v5, %s386_s0 }
  0x3d   :  { %177 = vrot.lane.b32.xlu1 %v442_v6, %s387_s26  ;;  %119 = vrot.lane.b32.xlu0 %v442_v6, %s386_s0 }
  0x41   :  { %179 = vrot.lane.b32.xlu1 %v446_v7, %s387_s26  ;;  %121 = vrot.lane.b32.xlu0 %v446_v7, %s386_s0 }
  0x97   :  { %v112_v10 = vpop.permute.xlu1 %111  ;;  %v450_v11 = vpop.permute.xlu0 %107 }
  0x9b   :  { %v452_v13 = vpop.permute.xlu1 %165  ;;  %v110_v14 = vpop.permute.xlu0 %109 }
  0x9c   :  { %v124_v17 = vsel %vm123_vm0, %v450_v11, %v110_v14  ;;  %v125_v19 = vsel %vm123_vm0, %v110_v14, %v112_v10 }
  0x9d   :  { %v141_v24 = vsub.f32 %v124_v17, %v420_v1  ;;  %v142_v28 = vsub.f32 %v125_v19, %v424_v2  ;;  %v88_v19 = vand.u32 31, %v80_v55 }
  0x9f   :  { %v170_v20 = vpop.permute.xlu1 %169  ;;  %v168_v21 = vpop.permute.xlu0 %167  ;;  %v149_v38 = vsel %vm91_vm2, 0.0, %v141_v24  ;;  %v150_v43 = vsel %vm92_vm3, 0.0, %v142_v28  ;;  %v62_v24 = vld [vmem:[#allocation2 + $0x20] sm:$0xff]  ;;  %vm497_vm7 = vcmp.eq.s32.totalorder %v88_v19, 31 }
  0xa0   :  { %v182_v25 = vsel %vm181_vm1, %v452_v13, %v168_v21  ;;  %v183_v26 = vsel %vm181_vm1, %v168_v21, %v170_v20  ;;  %v215_v48 = vsub.f32 %v58_v37, %v149_v38  ;;  %v216_v56 = vsub.f32 %v59_v42, %v150_v43  ;;  %v63_v43 = vld [vmem:[#allocation2 + $0x28] sm:$0xff] }
  0xa1   :  { %v199_v29 = vsub.f32 %v182_v25, %v420_v1  ;;  %v200_v30 = vsub.f32 %v183_v26, %v424_v2  ;;  %v81_v1 = vadd.s32 768, %v75_v9 }
  0xa2   :  { %v223_v14 = vand.u32 2147483647, %v215_v48 }
  0xa3   :  { %v172_v33 = vpop.permute.xlu1 %171  ;;  %v114_v35 = vpop.permute.xlu0 %113  ;;  %v231_v45 = vsub.f32 %v66_v31, %v199_v29  ;;  %v232_v46 = vsub.f32 %v67_v32, %v200_v30  ;;  %v89_v26 = vand.u32 31, %v81_v1 }
  0xa4   :  { %v184_v39 = vsel %vm181_vm1, %v170_v20, %v172_v33  ;;  %v126_v40 = vsel %vm123_vm0, %v112_v10, %v114_v35  ;;  %v224_v20 = vand.u32 2147483647, %v216_v56  ;;  %v72_v56 = vld [vmem:[#allocation5 + $0x30] sm:$0xff] }
  0xa5   :  { %v143_v44 = vsub.f32 %v126_v40, %v418_v0  ;;  %v201_v47 = vsub.f32 %v184_v39, %v418_v0  ;;  %v486_v0 = vadd.s32 896, %v75_v9  ;;  %v239_v2 = vand.u32 2147483647, %v231_v45  ;;  %v71_v39 = vld [vmem:[#allocation5 + $0x28] sm:$0xff] }
  0xa6   :  { %v240_v8 = vand.u32 2147483647, %v232_v46  ;;  %vm506_vm9 = vcmp.eq.s32.totalorder %v89_v26, 31 }
  0xa7   :  { %v151_v51 = vsel %vm464_vm4, 0.0, %v143_v44  ;;  %v174_v52 = vpop.permute.xlu1 %173  ;;  %v116_v54 = vpop.permute.xlu0 %115  ;;  %v233_v10 = vsub.f32 %v68_v49, %v201_v47  ;;  %v90_v27 = vand.u32 31, %v486_v0  ;;  %v247_v28 = vadd.f32 %v239_v2, %v223_v14 }
  0xa8   :  { %v185_v58 = vsel %vm181_vm1, %v172_v33, %v174_v52  ;;  %v127_v59 = vsel %vm123_vm0, %v114_v35, %v116_v54  ;;  %v217_v12 = vsub.f32 %v60_v50, %v151_v51  ;;  %v248_v29 = vadd.f32 %v240_v8, %v224_v20  ;;  %v64_v8 = vld [vmem:[#allocation2 + $0x30] sm:$0xff] }
  0xa9   :  { %v202_v61 = vsub.f32 %v185_v58, %v430_v3  ;;  %v144_v63 = vsub.f32 %v127_v59, %v430_v3  ;;  %v241_v30 = vand.u32 2147483647, %v233_v10  ;;  %vm164_vm8 = vcmp.ge.s32.totalorder %v486_v0, 992 }
  0xaa   :  { %v225_v31 = vand.u32 2147483647, %v217_v12  ;;  %v255_v45 = vadd.f32 %v248_v29, %v247_v28  ;;  %vm510_vm10 = vcmp.eq.s32.totalorder %v90_v27, 31 }
  0xab   :  { %v234_v15 = vsub.f32 %v69_v57, %v202_v61  ;;  %v152_v16 = vsel %vm474_vm5, 0.0, %v144_v63  ;;  %v176_v17 = vpop.permute.xlu1 %175  ;;  %v118_v18 = vpop.permute.xlu0 %117 }
  0xac   :  { %v218_v21 = vsub.f32 %v61_v62, %v152_v16  ;;  %v186_v3 = vsel %vm181_vm1, %v174_v52, %v176_v17  ;;  %v128_v23 = vsel %vm123_vm0, %v116_v54, %v118_v18  ;;  %v249_v46 = vadd.f32 %v241_v30, %v225_v31  ;;  %v65_v16 = vld [vmem:[#allocation2 + $0x38] sm:$0xff] }
  0xad   :  { %v203_v9 = vsub.f32 %v186_v3, %v434_v4  ;;  %v145_v25 = vsub.f32 %v128_v23, %v434_v4  ;;  %v242_v32 = vand.u32 2147483647, %v234_v15 }
  0xae   :  { %v226_v38 = vand.u32 2147483647, %v218_v21  ;;  %v256_v1 = vadd.f32 %v255_v45, %v249_v46 }
  0xaf   :  { %v235_v33 = vsub.f32 %v70_v22, %v203_v9  ;;  %v153_v34 = vsel %vm480_vm6, 0.0, %v145_v25  ;;  %v178_v35 = vpop.permute.xlu1 %177  ;;  %v120_v37 = vpop.permute.xlu0 %119 }
  0xb0   :  { %v219_v4 = vsub.f32 %v62_v24, %v153_v34  ;;  %v187_v40 = vsel %vm181_vm1, %v176_v17, %v178_v35  ;;  %v129_v41 = vsel %vm123_vm0, %v118_v18, %v120_v37  ;;  %v250_v54 = vadd.f32 %v242_v32, %v226_v38 }
  0xb1   :  { %v204_v42 = vsub.f32 %v187_v40, %v438_v5  ;;  %v146_v44 = vsub.f32 %v129_v41, %v438_v5  ;;  %v243_v49 = vand.u32 2147483647, %v235_v33 }
  0xb2   :  { %v227_v50 = vand.u32 2147483647, %v219_v4  ;;  %v257_v20 = vadd.f32 %v256_v1, %v250_v54 }
  0xb3   :  { %v236_v51 = vsub.f32 %v71_v39, %v204_v42  ;;  %v154_v52 = vsel %vm497_vm7, 0.0, %v146_v44  ;;  %v180_v53 = vpop.permute.xlu1 %179  ;;  %v122_v5 = vpop.permute.xlu0 %121 }
  0xb4   :  { %v220_v55 = vsub.f32 %v63_v43, %v154_v52  ;;  %v188_v57 = vsel %vm181_vm1, %v178_v35, %v180_v53  ;;  %v198_v58 = vsel %vm181_vm1, %v180_v53, %v452_v13  ;;  %v130_v63 = vsel %vm123_vm0, %v120_v37, %v122_v5 }
  0xb5   :  { %v244_v59 = vand.u32 2147483647, %v236_v51  ;;  %v205_v61 = vsub.f32 %v188_v57, %v442_v6  ;;  %v206_v62 = vsub.f32 %v198_v58, %v446_v7  ;;  %v140_v10 = vsel %vm123_vm0, %v122_v5, %v450_v11 }
  0xb6   :  { %v228_v2 = vand.u32 2147483647, %v220_v55  ;;  %v147_v12 = vsub.f32 %v130_v63, %v442_v6  ;;  %v251_v14 = vadd.f32 %v243_v49, %v227_v50  ;;  %v148_v17 = vsub.f32 %v140_v10, %v446_v7 }
  0xb7   :  { %v214_v13 = vsel %vm164_vm8, 0.0, %v206_v62  ;;  %v237_v15 = vsub.f32 %v72_v56, %v205_v61 }
  0xb8   :  { %v238_v18 = vsub.f32 %v73_v60, %v214_v13  ;;  %v155_v19 = vsel %vm506_vm9, 0.0, %v147_v12  ;;  %v156_v22 = vsel %vm510_vm10, 0.0, %v148_v17  ;;  %v252_v3 = vadd.f32 %v244_v59, %v228_v2 }
  0xb9   :  { %v245_v21 = vand.u32 2147483647, %v237_v15  ;;  %v221_v11 = vsub.f32 %v64_v8, %v155_v19  ;;  %v222_v6 = vsub.f32 %v65_v16, %v156_v22  ;;  %v258_v0 = vadd.f32 %v257_v20, %v251_v14 }
  0xba   :  { %v246_v9 = vand.u32 2147483647, %v238_v18 }
  0xbb   :  { %v229_v23 = vand.u32 2147483647, %v221_v11  ;;  %v230_v24 = vand.u32 2147483647, %v222_v6  ;;  %v259_v26 = vadd.f32 %v258_v0, %v252_v3 }
  0xbd   :  { %v253_v25 = vadd.f32 %v245_v21, %v229_v23  ;;  %v254_v27 = vadd.f32 %v246_v9, %v230_v24 }
  0xbf   :  { %v260_v7 = vadd.f32 %v259_v26, %v253_v25 }
  0xc1   :  { %v261_v28 = vadd.f32 %v260_v7, %v254_v27 }
  0xc3   :  { %262 = vadd.xlane.f32.xlu0 %v261_v28 }
 0x14c   :  { %v263_v29 = vpop.xlane.xlu0 %262 }
 0x14d   :  { %v264_v30 = vrot.slane %v263_v29, 4 }
 0x14f   :  { %v265_v31 = vadd.f32 %v264_v30, %v263_v29 }
 0x151   :  { %v266_v32 = vrot.slane %v265_v31, 2 }
 0x153   :  { %v267_v33 = vadd.f32 %v266_v32, %v265_v31 }
 0x155   :  { %v268_v34 = vrot.slane %v267_v33, 1 }
 0x157   :  { %v269_v35 = vadd.f32 %v268_v34, %v267_v33 }
 0x159   :  { %289 = vpush %v269_v35 }
 0x18a   :  { %s290_s28 = spop %289 }
 0x18b   :  { %v271_v36 = vstv %s290_s28 }
 0x18c   :  { %272 = vst [vmem:[#allocation8] sm:$0xff] %v271_v36 }
 0x18d   :  { %368 = shalt.err (!%p365_p5)
}
 0x18e   :  { %282 = dma.vmem_to_hbm [thread:$0]  %s280_s27, 128, %s538_s3, [#allocation4]  }
 0x18f   :  { %381 = dma.done.wait [#allocation4], 128  }
 0x190   :  { %382 = vsyncadd [#allocation4], 4294967168 }
 0x191   :  { %286 = vsyncpa [#allocation3], 1 }
 0x192   :  { %287 = vsyncpa [#allocation6], 1 }
 0x193   :  { %288 = vsyncpa [#allocation4], 1 }

</bundles_post_ra>
